<compile_context>
chip_gen: v5e
topology: v5e:2x2
jax: 0.10.0
libtpu: 0.0.40
codegen_flags: <defaults>
</compile_context>

<pallas_src>
import functools

import jax
import jax.numpy as jnp
from jax.experimental import pallas as pl
from jax.experimental.pallas import tpu as pltpu

BN_EPS = 1e-5
LANE = 128
TB_MAX = 2048  # batch-tile rows; keep working set well under every chip's VMEM


def _round_up(n, m):
    return ((n + m - 1) // m) * m


def _ffn_kernel(x_ref, w1_ref, w2_ref, w3_ref, vec_ref, o_ref, stat_ref,
                *, n_valid, tb):
    # vec_ref rows: 0=g1, 1=bt1, 2=g2, 3=bt2, 4=b3 (each zero-padded to P).
    # stat_ref rows: 0=sum(h1) 1=sum(h1^2) 2=sum(h2) 3=sum(h2^2)
    #                4=s1 5=t1 6=s2 7=t2
    ph = pl.program_id(0)
    ti = pl.program_id(1)
    nt = pl.num_programs(1)
    inv_n = 1.0 / n_valid

    vec = vec_ref[...]                           # single (8,P) load, then slice
    x = x_ref[...]                               # (tb, din) bf16

    # Zero-padded batch rows (beyond the true batch) must not pollute BN stats.
    row = ti * tb + jax.lax.broadcasted_iota(jnp.int32, (tb, 1), 0)
    rmask = (row < n_valid).astype(jnp.float32)  # (tb, 1) in {0,1}

    # linear1 (bias cancelled by training-mode BN): bf16 MXU, f32 accumulate.
    h1 = jnp.dot(x, w1_ref[...], preferred_element_type=jnp.float32)

    @pl.when(ph == 0)
    def _stats1():
        @pl.when(ti == 0)
        def _():
            stat_ref[...] = jnp.zeros_like(stat_ref)
        h1m = h1 * rmask
        stat_ref[0:1, :] += jnp.sum(h1m, axis=0, keepdims=True)
        stat_ref[1:2, :] += jnp.sum(h1m * h1, axis=0, keepdims=True)

        @pl.when(ti == nt - 1)
        def _():
            mu = stat_ref[0:1, :] * inv_n
            # E[h^2]-mu^2 with clamp; activations here are well-scaled.
            # TODO(synk): switch to centered/Welford sums if that changes.
            var = jnp.maximum(stat_ref[1:2, :] * inv_n - mu * mu, 0.0)
            s1 = vec[0:1, :] * jax.lax.rsqrt(var + BN_EPS)
            stat_ref[4:5, :] = s1
            stat_ref[5:6, :] = vec[1:2, :] - mu * s1

    @pl.when(ph > 0)
    def _apply():
        # BN1 folded to scale/shift + relu (f32), then linear2 on the MXU.
        a1 = jnp.maximum(h1 * stat_ref[4:5, :] + stat_ref[5:6, :], 0.0)
        h2 = jnp.dot(a1.astype(jnp.bfloat16), w2_ref[...],
                     preferred_element_type=jnp.float32)

        @pl.when(ph == 1)
        def _stats2():
            # rows 2,3 were zeroed at (ph=0, ti=0) and are untouched since.
            h2m = h2 * rmask
            stat_ref[2:3, :] += jnp.sum(h2m, axis=0, keepdims=True)
            stat_ref[3:4, :] += jnp.sum(h2m * h2, axis=0, keepdims=True)

            @pl.when(ti == nt - 1)
            def _():
                mu2 = stat_ref[2:3, :] * inv_n
                var2 = jnp.maximum(stat_ref[3:4, :] * inv_n - mu2 * mu2, 0.0)
                s2 = vec[2:3, :] * jax.lax.rsqrt(var2 + BN_EPS)
                stat_ref[6:7, :] = s2
                stat_ref[7:8, :] = vec[3:4, :] - mu2 * s2

        @pl.when(ph == 2)
        def _head():
            a2 = jnp.maximum(h2 * stat_ref[6:7, :] + stat_ref[7:8, :], 0.0)
            y = jnp.dot(a2.astype(jnp.bfloat16), w3_ref[...],
                        preferred_element_type=jnp.float32) + vec[4:5, :]
            o_ref[...] = y.astype(o_ref.dtype)   # lane-dense bf16 store


@functools.partial(jax.jit, static_argnames=("out_size",))
def ffn_forward(x_nchw, packed, out_size):
    w1p, w2p, w3p, vec = packed
    B = x_nchw.shape[0]
    x2d = x_nchw.reshape(B, -1).astype(jnp.bfloat16)   # torch: input.view(B,-1)
    din = x2d.shape[1]
    P = w1p.shape[1]

    TB = min(TB_MAX, _round_up(B, 16))      # bf16 sublane-friendly batch tile
    NT = pl.cdiv(B, TB)
    B_pad = NT * TB
    if B_pad != B:
        # Zero rows: contribute 0 to h1 stats (no linear bias) and are masked
        # out of h2 stats in-kernel; sliced off below.
        x2d = jnp.pad(x2d, ((0, B_pad - B), (0, 0)))

    kernel = functools.partial(_ffn_kernel, n_valid=B, tb=TB)

    cost = pl.CostEstimate(
        flops=2 * B_pad * (3 * din * P + 3 * P * P),
        transcendentals=2 * P,
        bytes_accessed=2 * (3 * B_pad * din + w1p.size + w2p.size + w3p.size
                            + B_pad * P) + 4 * vec.size,
    )

    out_p = pl.pallas_call(
        kernel,
        out_shape=jax.ShapeDtypeStruct((B_pad, P), jnp.bfloat16),
        grid=(3, NT),                       # (phase, batch tile); phase-major
        in_specs=[
            pl.BlockSpec((TB, din), lambda ph, i: (i, 0)),   # x: streamed/phase
            pl.BlockSpec((din, P), lambda ph, i: (0, 0)),    # weights resident
            pl.BlockSpec((P, P), lambda ph, i: (0, 0)),
            pl.BlockSpec((P, P), lambda ph, i: (0, 0)),
            pl.BlockSpec((8, P), lambda ph, i: (0, 0)),      # packed vec params
        ],
        # Output block only advances during phase 2 -> each tile is written
        # back to HBM exactly once (no stale/partial writebacks).
        out_specs=pl.BlockSpec((TB, P),
                               lambda ph, i: (jnp.where(ph == 2, i, 0), 0)),
        scratch_shapes=[pltpu.VMEM((8, P), jnp.float32)],
        compiler_params=pltpu.CompilerParams(
            dimension_semantics=("arbitrary", "arbitrary"),
            vmem_limit_bytes=32 * 1024 * 1024,  # fits v5e/v6e/v7x with headroom
        ),
        cost_estimate=cost,
    )(x2d, w1p, w2p, w3p, vec)

    return out_p[:B, :out_size].astype(jnp.float32)


def _xavier_uniform(key, fan_in, fan_out):
    bound = (6.0 / (fan_in + fan_out)) ** 0.5
    return jax.random.uniform(key, (fan_in, fan_out), jnp.float32, -bound, bound)


def init_params(key, input_size, hidden_size, output_size):
    """Logical (unpadded) parameters, mirroring the PyTorch module's init."""
    h2 = hidden_size // 2
    k1, k2, k3, kb1, kb2, kb3 = jax.random.split(key, 6)
    # manualWeightInit=True -> xavier_uniform_ on weights (stored as (in, out)).
    w1 = _xavier_uniform(k1, input_size, hidden_size)
    w2 = _xavier_uniform(k2, hidden_size, h2)
    w3 = _xavier_uniform(k3, h2, output_size)
    # PyTorch Linear default bias init: U(-1/sqrt(fan_in), 1/sqrt(fan_in)).
    b1 = jax.random.uniform(kb1, (1, hidden_size), jnp.float32,
                            -1.0 / input_size ** 0.5, 1.0 / input_size ** 0.5)
    b2 = jax.random.uniform(kb2, (1, h2), jnp.float32,
                            -1.0 / hidden_size ** 0.5, 1.0 / hidden_size ** 0.5)
    b3 = jax.random.uniform(kb3, (1, output_size), jnp.float32,
                            -1.0 / h2 ** 0.5, 1.0 / h2 ** 0.5)
    # BatchNorm1d affine params: gamma=1, beta=0.
    g1 = jnp.ones((1, hidden_size), jnp.float32)
    bt1 = jnp.zeros((1, hidden_size), jnp.float32)
    g2 = jnp.ones((1, h2), jnp.float32)
    bt2 = jnp.zeros((1, h2), jnp.float32)
    return (w1, b1, g1, bt1, w2, b2, g2, bt2, w3, b3)


def pack_params(params):
    """Pad all feature dims to one lane-dense width P, cast weights to bf16
    (MXU operands) and pack the five (1,F) vector params into one (8,P) f32
    array (single DMA).  b1/b2 are dropped (cancelled by training-mode BN);
    padded gamma/beta/b3 entries are ZERO so padded columns stay exactly 0."""
    (w1, b1, g1, bt1, w2, b2, g2, bt2, w3, b3) = params
    del b1, b2  # cancelled by training-mode BatchNorm mean subtraction
    din, hidden = w1.shape
    h2 = w2.shape[1]
    out = w3.shape[1]
    P = _round_up(max(hidden, h2, out, LANE), LANE)

    def pad_w(w, rows, cols):
        wp = jnp.zeros((rows, cols), jnp.float32)
        wp = wp.at[:w.shape[0], :w.shape[1]].set(w)
        return wp.astype(jnp.bfloat16)

    w1p = pad_w(w1, din, P)
    w2p = pad_w(w2, P, P)
    w3p = pad_w(w3, P, P)

    vec = jnp.zeros((8, P), jnp.float32)
    vec = vec.at[0, :hidden].set(g1[0])
    vec = vec.at[1, :hidden].set(bt1[0])
    vec = vec.at[2, :h2].set(g2[0])
    vec = vec.at[3, :h2].set(bt2[0])
    vec = vec.at[4, :out].set(b3[0])
    return (w1p, w2p, w3p, vec)


def _reference(x_nchw, params):
    """Pure-JAX forward with the SAME bf16 matmul-operand quantization the
    kernel uses (f32 accumulation, f32 BN/relu, biases included), so the
    comparison isolates kernel structure from bf16 rounding."""
    (w1, b1, g1, bt1, w2, b2, g2, bt2, w3, b3) = params
    x = x_nchw.reshape(x_nchw.shape[0], -1)

    def q(a):
        return a.astype(jnp.bfloat16).astype(jnp.float32)

    def mm(a, b):
        return jnp.dot(q(a), q(b), precision=jax.lax.Precision.HIGHEST)

    def bn(h, g, bt):
        mu = h.mean(0, keepdims=True)
        var = ((h - mu) ** 2).mean(0, keepdims=True)
        return (h - mu) / jnp.sqrt(var + BN_EPS) * g + bt

    h = jax.nn.relu(bn(mm(x, w1) + b1, g1, bt1))
    h = jax.nn.relu(bn(mm(h, w2) + b2, g2, bt2))
    return mm(h, w3) + b3


if __name__ == "__main__":
    key = jax.random.PRNGKey(0)
    kx, kp = jax.random.split(key)

    # Small shapes consistent with the module: NCHW input flattened to
    # inputSize = C*H*W = 4*8*8 = 256, hiddenSize = 32, outputSize = 10.
    B, C, H, W = 8, 4, 8, 8
    input_size, hidden_size, output_size = C * H * W, 32, 10

    x = jax.random.normal(kx, (B, C, H, W), jnp.float32)
    params = init_params(kp, input_size, hidden_size, output_size)
    packed = pack_params(params)

    out = jax.block_until_ready(ffn_forward(x, packed, output_size))
    ref = _reference(x, params)

    assert out.shape == (B, output_size)
    max_err = float(jnp.max(jnp.abs(out - ref)))
    assert jnp.allclose(out, ref, atol=2e-2, rtol=2e-2), max_err

    print("KERNEL_OK")
</pallas_src>

<mosaic_0001>
module attributes {stable_mosaic.version = 11 : i64} {
  func.func @_ffn_kernel(%arg0: i32, %arg1: i32, %arg2: memref<16x256xbf16, #tpu.memory_space<vmem>>, %arg3: memref<256x128xbf16, #tpu.memory_space<vmem>>, %arg4: memref<128x128xbf16, #tpu.memory_space<vmem>>, %arg5: memref<128x128xbf16, #tpu.memory_space<vmem>>, %arg6: memref<8x128xf32, #tpu.memory_space<vmem>>, %arg7: memref<16x128xbf16, #tpu.memory_space<vmem>>, %arg8: memref<8x128xf32, #tpu.memory_space<vmem>>) attributes {dimension_semantics = [#tpu.dimension_semantics<arbitrary>, #tpu.dimension_semantics<arbitrary>], iteration_bounds = array<i64: 3, 1>, scalar_prefetch = 0 : i64, scratch_operands = 1 : i64, tpu.core_type = #tpu.core_type<tc>, window_params = [{transform_indices = @transform_0, window_bounds = array<i64: 16, 256>}, {pipeline_mode = #tpu.pipeline_mode<synchronous>, transform_indices = @transform_1, window_bounds = array<i64: 256, 128>}, {pipeline_mode = #tpu.pipeline_mode<synchronous>, transform_indices = @transform_2, window_bounds = array<i64: 128, 128>}, {pipeline_mode = #tpu.pipeline_mode<synchronous>, transform_indices = @transform_3, window_bounds = array<i64: 128, 128>}, {pipeline_mode = #tpu.pipeline_mode<synchronous>, transform_indices = @transform_4, window_bounds = array<i64: 8, 128>}, {transform_indices = @transform_5, window_bounds = array<i64: 16, 128>}]} {
    %c0 = arith.constant 0 : index
    %c0_0 = arith.constant 0 : index
    %0 = vector.load %arg6[%c0, %c0_0] : memref<8x128xf32, #tpu.memory_space<vmem>>, vector<8x128xf32>
    %c0_1 = arith.constant 0 : index
    %c0_2 = arith.constant 0 : index
    %1 = vector.load %arg2[%c0_1, %c0_2] : memref<16x256xbf16, #tpu.memory_space<vmem>>, vector<16x256xbf16>
    %c16_i32 = arith.constant 16 : i32
    %2 = arith.muli %arg1, %c16_i32 : i32
    %3 = tpu.iota {dimensions = array<i32: 0>} : vector<16x1xi32>
    %4 = vector.broadcast %2 : i32 to vector<16x1xi32>
    %5 = arith.addi %4, %3 : vector<16x1xi32>
    %c8_i32 = arith.constant 8 : i32
    %6 = vector.broadcast %c8_i32 : i32 to vector<16x1xi32>
    %7 = arith.cmpi slt, %5, %6 : vector<16x1xi32>
    %8 = arith.extui %7 : vector<16x1xi1> to vector<16x1xi32>
    %9 = arith.sitofp %8 : vector<16x1xi32> to vector<16x1xf32>
    %c0_3 = arith.constant 0 : index
    %c0_4 = arith.constant 0 : index
    %10 = vector.load %arg3[%c0_3, %c0_4] : memref<256x128xbf16, #tpu.memory_space<vmem>>, vector<256x128xbf16>
    %cst = arith.constant dense<0.000000e+00> : vector<16x128xf32>
    %11 = tpu.matmul %1, %10, %cst {dimension_numbers = #tpu.dot_dimension_numbers<[1], [0], [0], [1], [0, 0, 1, 1], [], []>} : vector<16x256xbf16>, vector<256x128xbf16>, vector<16x128xf32> -> vector<16x128xf32>
    %c0_i32 = arith.constant 0 : i32
    %12 = arith.cmpi eq, %arg0, %c0_i32 : i32
    %13 = arith.extui %12 : i1 to i32
    %c0_i32_5 = arith.constant 0 : i32
    %14 = arith.cmpi ne, %13, %c0_i32_5 : i32
    scf.if %14 {
      %c0_i32_8 = arith.constant 0 : i32
      %18 = arith.cmpi eq, %arg1, %c0_i32_8 : i32
      %19 = arith.extui %18 : i1 to i32
      %c0_i32_9 = arith.constant 0 : i32
      %20 = arith.cmpi ne, %19, %c0_i32_9 : i32
      scf.if %20 {
        %cst_21 = arith.constant 0.000000e+00 : f32
        %37 = vector.broadcast %cst_21 : f32 to vector<8x128xf32>
        %c0_22 = arith.constant 0 : index
        %c0_23 = arith.constant 0 : index
        %38 = vector.load %arg8[%c0_22, %c0_23] : memref<8x128xf32, #tpu.memory_space<vmem>>, vector<8x128xf32>
        tpu.vector_store %arg8[%c0_22, %c0_23], %37 {strides = array<i32>} : memref<8x128xf32, #tpu.memory_space<vmem>>, vector<8x128xf32>,
      } else {
      }
      %21 = vector.broadcast %9 : vector<16x1xf32> to vector<16x128xf32>
      %22 = arith.mulf %11, %21 : vector<16x128xf32>
      %c0_10 = arith.constant 0 : index
      %c0_11 = arith.constant 0 : index
      %23 = vector.load %arg8[%c0_10, %c0_11] : memref<8x128xf32, #tpu.memory_space<vmem>>, vector<1x128xf32>
      %cst_12 = arith.constant dense<0.000000e+00> : vector<128xf32>
      %24 = vector.multi_reduction <add>, %22, %cst_12 [0] : vector<16x128xf32> to vector<128xf32>
      %25 = vector.shape_cast %24 : vector<128xf32> to vector<1x128xf32>
      %26 = arith.addf %23, %25 : vector<1x128xf32>
      %c0_13 = arith.constant 0 : index
      %c0_14 = arith.constant 0 : index
      %27 = vector.load %arg8[%c0_13, %c0_14] : memref<8x128xf32, #tpu.memory_space<vmem>>, vector<1x128xf32>
      tpu.vector_store %arg8[%c0_13, %c0_14], %26 {strides = array<i32>} : memref<8x128xf32, #tpu.memory_space<vmem>>, vector<1x128xf32>,
      %c1 = arith.constant 1 : index
      %c0_15 = arith.constant 0 : index
      %28 = vector.load %arg8[%c1, %c0_15] : memref<8x128xf32, #tpu.memory_space<vmem>>, vector<1x128xf32>
      %29 = arith.mulf %22, %11 : vector<16x128xf32>
      %cst_16 = arith.constant dense<0.000000e+00> : vector<128xf32>
      %30 = vector.multi_reduction <add>, %29, %cst_16 [0] : vector<16x128xf32> to vector<128xf32>
      %31 = vector.shape_cast %30 : vector<128xf32> to vector<1x128xf32>
      %32 = arith.addf %28, %31 : vector<1x128xf32>
      %c1_17 = arith.constant 1 : index
      %c0_18 = arith.constant 0 : index
      %33 = vector.load %arg8[%c1_17, %c0_18] : memref<8x128xf32, #tpu.memory_space<vmem>>, vector<1x128xf32>
      tpu.vector_store %arg8[%c1_17, %c0_18], %32 {strides = array<i32>} : memref<8x128xf32, #tpu.memory_space<vmem>>, vector<1x128xf32>,
      %c0_i32_19 = arith.constant 0 : i32
      %34 = arith.cmpi eq, %arg1, %c0_i32_19 : i32
      %35 = arith.extui %34 : i1 to i32
      %c0_i32_20 = arith.constant 0 : i32
      %36 = arith.cmpi ne, %35, %c0_i32_20 : i32
      scf.if %36 {
        %c0_21 = arith.constant 0 : index
        %c0_22 = arith.constant 0 : index
        %37 = vector.load %arg8[%c0_21, %c0_22] : memref<8x128xf32, #tpu.memory_space<vmem>>, vector<1x128xf32>
        %cst_23 = arith.constant 1.250000e-01 : f32
        %38 = vector.broadcast %cst_23 : f32 to vector<1x128xf32>
        %39 = arith.mulf %37, %38 : vector<1x128xf32>
        %c1_24 = arith.constant 1 : index
        %c0_25 = arith.constant 0 : index
        %40 = vector.load %arg8[%c1_24, %c0_25] : memref<8x128xf32, #tpu.memory_space<vmem>>, vector<1x128xf32>
        %cst_26 = arith.constant 1.250000e-01 : f32
        %41 = vector.broadcast %cst_26 : f32 to vector<1x128xf32>
        %42 = arith.mulf %40, %41 : vector<1x128xf32>
        %43 = arith.mulf %39, %39 : vector<1x128xf32>
        %44 = arith.subf %42, %43 : vector<1x128xf32>
        %cst_27 = arith.constant 0.000000e+00 : f32
        %45 = vector.broadcast %cst_27 : f32 to vector<1x128xf32>
        %46 = arith.maximumf %44, %45 : vector<1x128xf32>
        %47 = vector.extract_strided_slice %0 {offsets = [0, 0], sizes = [1, 128], strides = [1, 1]} : vector<8x128xf32> to vector<1x128xf32>
        %cst_28 = arith.constant 9.99999974E-6 : f32
        %48 = vector.broadcast %cst_28 : f32 to vector<1x128xf32>
        %49 = arith.addf %46, %48 : vector<1x128xf32>
        %50 = math.rsqrt %49 : vector<1x128xf32>
        %51 = arith.mulf %47, %50 : vector<1x128xf32>
        %c4 = arith.constant 4 : index
        %c0_29 = arith.constant 0 : index
        %52 = vector.load %arg8[%c4, %c0_29] : memref<8x128xf32, #tpu.memory_space<vmem>>, vector<1x128xf32>
        tpu.vector_store %arg8[%c4, %c0_29], %51 {strides = array<i32>} : memref<8x128xf32, #tpu.memory_space<vmem>>, vector<1x128xf32>,
        %53 = vector.extract_strided_slice %0 {offsets = [1, 0], sizes = [1, 128], strides = [1, 1]} : vector<8x128xf32> to vector<1x128xf32>
        %54 = arith.mulf %39, %51 : vector<1x128xf32>
        %55 = arith.subf %53, %54 : vector<1x128xf32>
        %c5 = arith.constant 5 : index
        %c0_30 = arith.constant 0 : index
        %56 = vector.load %arg8[%c5, %c0_30] : memref<8x128xf32, #tpu.memory_space<vmem>>, vector<1x128xf32>
        tpu.vector_store %arg8[%c5, %c0_30], %55 {strides = array<i32>} : memref<8x128xf32, #tpu.memory_space<vmem>>, vector<1x128xf32>,
      } else {
      }
    } else {
    }
    %c0_i32_6 = arith.constant 0 : i32
    %15 = arith.cmpi sgt, %arg0, %c0_i32_6 : i32
    %16 = arith.extui %15 : i1 to i32
    %c0_i32_7 = arith.constant 0 : i32
    %17 = arith.cmpi ne, %16, %c0_i32_7 : i32
    scf.if %17 {
      %c4 = arith.constant 4 : index
      %c0_8 = arith.constant 0 : index
      %18 = vector.load %arg8[%c4, %c0_8] : memref<8x128xf32, #tpu.memory_space<vmem>>, vector<1x128xf32>
      %19 = vector.broadcast %18 : vector<1x128xf32> to vector<16x128xf32>
      %20 = arith.mulf %11, %19 : vector<16x128xf32>
      %c5 = arith.constant 5 : index
      %c0_9 = arith.constant 0 : index
      %21 = vector.load %arg8[%c5, %c0_9] : memref<8x128xf32, #tpu.memory_space<vmem>>, vector<1x128xf32>
      %22 = vector.broadcast %21 : vector<1x128xf32> to vector<16x128xf32>
      %23 = arith.addf %20, %22 : vector<16x128xf32>
      %cst_10 = arith.constant 0.000000e+00 : f32
      %24 = vector.broadcast %cst_10 : f32 to vector<16x128xf32>
      %25 = arith.maximumf %23, %24 : vector<16x128xf32>
      %26 = arith.truncf %25 : vector<16x128xf32> to vector<16x128xbf16>
      %c0_11 = arith.constant 0 : index
      %c0_12 = arith.constant 0 : index
      %27 = vector.load %arg4[%c0_11, %c0_12] : memref<128x128xbf16, #tpu.memory_space<vmem>>, vector<128x128xbf16>
      %cst_13 = arith.constant dense<0.000000e+00> : vector<16x128xf32>
      %28 = tpu.matmul %26, %27, %cst_13 {dimension_numbers = #tpu.dot_dimension_numbers<[1], [0], [0], [1], [0, 0, 1, 1], [], []>} : vector<16x128xbf16>, vector<128x128xbf16>, vector<16x128xf32> -> vector<16x128xf32>
      %c1_i32 = arith.constant 1 : i32
      %29 = arith.cmpi eq, %arg0, %c1_i32 : i32
      %30 = arith.extui %29 : i1 to i32
      %c0_i32_14 = arith.constant 0 : i32
      %31 = arith.cmpi ne, %30, %c0_i32_14 : i32
      scf.if %31 {
        %35 = vector.broadcast %9 : vector<16x1xf32> to vector<16x128xf32>
        %36 = arith.mulf %28, %35 : vector<16x128xf32>
        %c2 = arith.constant 2 : index
        %c0_16 = arith.constant 0 : index
        %37 = vector.load %arg8[%c2, %c0_16] : memref<8x128xf32, #tpu.memory_space<vmem>>, vector<1x128xf32>
        %cst_17 = arith.constant dense<0.000000e+00> : vector<128xf32>
        %38 = vector.multi_reduction <add>, %36, %cst_17 [0] : vector<16x128xf32> to vector<128xf32>
        %39 = vector.shape_cast %38 : vector<128xf32> to vector<1x128xf32>
        %40 = arith.addf %37, %39 : vector<1x128xf32>
        %c2_18 = arith.constant 2 : index
        %c0_19 = arith.constant 0 : index
        %41 = vector.load %arg8[%c2_18, %c0_19] : memref<8x128xf32, #tpu.memory_space<vmem>>, vector<1x128xf32>
        tpu.vector_store %arg8[%c2_18, %c0_19], %40 {strides = array<i32>} : memref<8x128xf32, #tpu.memory_space<vmem>>, vector<1x128xf32>,
        %c3 = arith.constant 3 : index
        %c0_20 = arith.constant 0 : index
        %42 = vector.load %arg8[%c3, %c0_20] : memref<8x128xf32, #tpu.memory_space<vmem>>, vector<1x128xf32>
        %43 = arith.mulf %36, %28 : vector<16x128xf32>
        %cst_21 = arith.constant dense<0.000000e+00> : vector<128xf32>
        %44 = vector.multi_reduction <add>, %43, %cst_21 [0] : vector<16x128xf32> to vector<128xf32>
        %45 = vector.shape_cast %44 : vector<128xf32> to vector<1x128xf32>
        %46 = arith.addf %42, %45 : vector<1x128xf32>
        %c3_22 = arith.constant 3 : index
        %c0_23 = arith.constant 0 : index
        %47 = vector.load %arg8[%c3_22, %c0_23] : memref<8x128xf32, #tpu.memory_space<vmem>>, vector<1x128xf32>
        tpu.vector_store %arg8[%c3_22, %c0_23], %46 {strides = array<i32>} : memref<8x128xf32, #tpu.memory_space<vmem>>, vector<1x128xf32>,
        %c0_i32_24 = arith.constant 0 : i32
        %48 = arith.cmpi eq, %arg1, %c0_i32_24 : i32
        %49 = arith.extui %48 : i1 to i32
        %c0_i32_25 = arith.constant 0 : i32
        %50 = arith.cmpi ne, %49, %c0_i32_25 : i32
        scf.if %50 {
          %c2_26 = arith.constant 2 : index
          %c0_27 = arith.constant 0 : index
          %51 = vector.load %arg8[%c2_26, %c0_27] : memref<8x128xf32, #tpu.memory_space<vmem>>, vector<1x128xf32>
          %cst_28 = arith.constant 1.250000e-01 : f32
          %52 = vector.broadcast %cst_28 : f32 to vector<1x128xf32>
          %53 = arith.mulf %51, %52 : vector<1x128xf32>
          %c3_29 = arith.constant 3 : index
          %c0_30 = arith.constant 0 : index
          %54 = vector.load %arg8[%c3_29, %c0_30] : memref<8x128xf32, #tpu.memory_space<vmem>>, vector<1x128xf32>
          %cst_31 = arith.constant 1.250000e-01 : f32
          %55 = vector.broadcast %cst_31 : f32 to vector<1x128xf32>
          %56 = arith.mulf %54, %55 : vector<1x128xf32>
          %57 = arith.mulf %53, %53 : vector<1x128xf32>
          %58 = arith.subf %56, %57 : vector<1x128xf32>
          %cst_32 = arith.constant 0.000000e+00 : f32
          %59 = vector.broadcast %cst_32 : f32 to vector<1x128xf32>
          %60 = arith.maximumf %58, %59 : vector<1x128xf32>
          %61 = vector.extract_strided_slice %0 {offsets = [2, 0], sizes = [1, 128], strides = [1, 1]} : vector<8x128xf32> to vector<1x128xf32>
          %cst_33 = arith.constant 9.99999974E-6 : f32
          %62 = vector.broadcast %cst_33 : f32 to vector<1x128xf32>
          %63 = arith.addf %60, %62 : vector<1x128xf32>
          %64 = math.rsqrt %63 : vector<1x128xf32>
          %65 = arith.mulf %61, %64 : vector<1x128xf32>
          %c6 = arith.constant 6 : index
          %c0_34 = arith.constant 0 : index
          %66 = vector.load %arg8[%c6, %c0_34] : memref<8x128xf32, #tpu.memory_space<vmem>>, vector<1x128xf32>
          tpu.vector_store %arg8[%c6, %c0_34], %65 {strides = array<i32>} : memref<8x128xf32, #tpu.memory_space<vmem>>, vector<1x128xf32>,
          %67 = vector.extract_strided_slice %0 {offsets = [3, 0], sizes = [1, 128], strides = [1, 1]} : vector<8x128xf32> to vector<1x128xf32>
          %68 = arith.mulf %53, %65 : vector<1x128xf32>
          %69 = arith.subf %67, %68 : vector<1x128xf32>
          %c7 = arith.constant 7 : index
          %c0_35 = arith.constant 0 : index
          %70 = vector.load %arg8[%c7, %c0_35] : memref<8x128xf32, #tpu.memory_space<vmem>>, vector<1x128xf32>
          tpu.vector_store %arg8[%c7, %c0_35], %69 {strides = array<i32>} : memref<8x128xf32, #tpu.memory_space<vmem>>, vector<1x128xf32>,
        } else {
        }
      } else {
      }
      %c2_i32 = arith.constant 2 : i32
      %32 = arith.cmpi eq, %arg0, %c2_i32 : i32
      %33 = arith.extui %32 : i1 to i32
      %c0_i32_15 = arith.constant 0 : i32
      %34 = arith.cmpi ne, %33, %c0_i32_15 : i32
      scf.if %34 {
        %c6 = arith.constant 6 : index
        %c0_16 = arith.constant 0 : index
        %35 = vector.load %arg8[%c6, %c0_16] : memref<8x128xf32, #tpu.memory_space<vmem>>, vector<1x128xf32>
        %36 = vector.broadcast %35 : vector<1x128xf32> to vector<16x128xf32>
        %37 = arith.mulf %28, %36 : vector<16x128xf32>
        %c7 = arith.constant 7 : index
        %c0_17 = arith.constant 0 : index
        %38 = vector.load %arg8[%c7, %c0_17] : memref<8x128xf32, #tpu.memory_space<vmem>>, vector<1x128xf32>
        %39 = vector.broadcast %38 : vector<1x128xf32> to vector<16x128xf32>
        %40 = arith.addf %37, %39 : vector<16x128xf32>
        %cst_18 = arith.constant 0.000000e+00 : f32
        %41 = vector.broadcast %cst_18 : f32 to vector<16x128xf32>
        %42 = arith.maximumf %40, %41 : vector<16x128xf32>
        %43 = arith.truncf %42 : vector<16x128xf32> to vector<16x128xbf16>
        %c0_19 = arith.constant 0 : index
        %c0_20 = arith.constant 0 : index
        %44 = vector.load %arg5[%c0_19, %c0_20] : memref<128x128xbf16, #tpu.memory_space<vmem>>, vector<128x128xbf16>
        %cst_21 = arith.constant dense<0.000000e+00> : vector<16x128xf32>
        %45 = tpu.matmul %43, %44, %cst_21 {dimension_numbers = #tpu.dot_dimension_numbers<[1], [0], [0], [1], [0, 0, 1, 1], [], []>} : vector<16x128xbf16>, vector<128x128xbf16>, vector<16x128xf32> -> vector<16x128xf32>
        %46 = vector.extract_strided_slice %0 {offsets = [4, 0], sizes = [1, 128], strides = [1, 1]} : vector<8x128xf32> to vector<1x128xf32>
        %47 = vector.broadcast %46 : vector<1x128xf32> to vector<16x128xf32>
        %48 = arith.addf %45, %47 : vector<16x128xf32>
        %49 = arith.truncf %48 : vector<16x128xf32> to vector<16x128xbf16>
        %c0_22 = arith.constant 0 : index
        %c0_23 = arith.constant 0 : index
        %50 = vector.load %arg7[%c0_22, %c0_23] : memref<16x128xbf16, #tpu.memory_space<vmem>>, vector<16x128xbf16>
        tpu.vector_store %arg7[%c0_22, %c0_23], %49 {strides = array<i32>} : memref<16x128xbf16, #tpu.memory_space<vmem>>, vector<16x128xbf16>,
      } else {
      }
    } else {
    }
    return
  }
  func.func @transform_0(%arg0: i32, %arg1: i32) -> (i32, i32) {
    %c0_i32 = arith.constant 0 : i32
    %c0_i32_0 = arith.constant 0 : i32
    return %arg1, %c0_i32 : i32, i32
  }
  func.func @transform_1(%arg0: i32, %arg1: i32) -> (i32, i32) {
    %c0_i32 = arith.constant 0 : i32
    %c0_i32_0 = arith.constant 0 : i32
    %c0_i32_1 = arith.constant 0 : i32
    return %c0_i32, %c0_i32_0 : i32, i32
  }
  func.func @transform_2(%arg0: i32, %arg1: i32) -> (i32, i32) {
    %c0_i32 = arith.constant 0 : i32
    %c0_i32_0 = arith.constant 0 : i32
    %c0_i32_1 = arith.constant 0 : i32
    return %c0_i32, %c0_i32_0 : i32, i32
  }
  func.func @transform_3(%arg0: i32, %arg1: i32) -> (i32, i32) {
    %c0_i32 = arith.constant 0 : i32
    %c0_i32_0 = arith.constant 0 : i32
    %c0_i32_1 = arith.constant 0 : i32
    return %c0_i32, %c0_i32_0 : i32, i32
  }
  func.func @transform_4(%arg0: i32, %arg1: i32) -> (i32, i32) {
    %c0_i32 = arith.constant 0 : i32
    %c0_i32_0 = arith.constant 0 : i32
    %c0_i32_1 = arith.constant 0 : i32
    return %c0_i32, %c0_i32_0 : i32, i32
  }
  func.func @transform_5(%arg0: i32, %arg1: i32) -> (i32, i32) {
    %c2_i32 = arith.constant 2 : i32
    %0 = arith.cmpi eq, %arg0, %c2_i32 : i32
    %c0_i32 = arith.constant 0 : i32
    %1 = arith.select %0, %arg1, %c0_i32 : i32
    %c0_i32_0 = arith.constant 0 : i32
    %c0_i32_1 = arith.constant 0 : i32
    return %1, %c0_i32_0 : i32, i32
  }
}

</mosaic_0001>

<bundles_post_ra>
// kernel: ffn_forward.1
= control target key start
LH: loop header
LB: loop body
LE: loop exit
PB: predicated region body
PF: predicated region fallthrough
CT: control target
= control target key end

     0   :  { %s1102_s18 = smov 0   ;;  %s1104_s19 = smov 0   ;;  %s1278_s0 = inlined_call_operand.vmem [shape: bf16[16,256], index: 0, kind: input, shape index: {}]   ;;  %s1279_s1 = inlined_call_operand.vmem [shape: bf16[256,128], index: 1, kind: input, shape index: {}]   ;;  %s1280_s2 = inlined_call_operand.vmem [shape: bf16[128,128], index: 2, kind: input, shape index: {}]   ;;  %s1281_s3 = inlined_call_operand.vmem [shape: bf16[128,128], index: 3, kind: input, shape index: {}]   ;;  %s1282_s4 = inlined_call_operand.vmem [shape: f32[8,128], index: 4, kind: input, shape index: {}]   ;;  %s1283_s5 = inlined_call_operand.vmem [shape: bf16[16,128], index: 5, kind: output, shape index: {}]  }
   0x1   :  { %s1106_s20 = smov 0  }
   0x2 LB: > { %s27_s21 = sadd.s32 1, %s1065_s19  ;;  %p830_p0 = scmp.ge.s32.totalorder %s1069_s20, 1  ;;  %s1069_s20 = sphi %s1106_s20, %s15_s20   ;;  %s1065_s19 = sphi %s1104_s19, %s1285_s19   ;;  %s1061_s18 = sphi %s1102_s18, %s1284_s18  }
   0x3   : > { %p29_p1 = scmp.ge.s32.totalorder %s27_s21, 3  ;;  %p205_p2 = scmp.lt.s32.totalorder %s1069_s20, 4 }
   0x5   : > { %s1287_s21 = smov (%p29_p1, %s27_s21), 0  ;;  %p206_p3 = pnand %p830_p0, %p205_p2 }
   0x6   : > { %p903_p4 = scmp.ne.s32.totalorder (!%p206_p3), %s1061_s18, 0 }
   0x7   : > { %209 = sbr.rel (%p206_p3) target bundleno = 662 (0x296), region = 40 }
   0xc   : > { %v1125_v0 = vld [vmem:[%s1282_s4] sm:$0xff]  ;;  %v984_v1 = vld [vmem:[%s1279_s1 + $0x38] sm:$0xff]  ;;  %v983_v3 = vld [vmem:[%s1279_s1 + $0x30] sm:$0xff] }
   0xd   : > { %v992_v2 = vld [vmem:[%s1279_s1 + $0x78] sm:$0xff]  ;;  %407 = vmatpush.bf16.msra.mxu0 %v984_v1  ;;  %v991_v4 = vld [vmem:[%s1279_s1 + $0x70] sm:$0xff]  ;;  %v982_v5 = vld [vmem:[%s1279_s1 + $0x28] sm:$0xff] }
   0xe   : > { %421 = vmatpush.bf16.msra.mxu1 %v992_v2  ;;  %v990_v6 = vld [vmem:[%s1279_s1 + $0x68] sm:$0xff]  ;;  %v981_v7 = vld [vmem:[%s1279_s1 + $0x20] sm:$0xff]  ;;  %v980_v9 = vld [vmem:[%s1279_s1 + $0x18] sm:$0xff] }
   0xf   : > { %v989_v8 = vld [vmem:[%s1279_s1 + $0x60] sm:$0xff]  ;;  %v988_v10 = vld [vmem:[%s1279_s1 + $0x58] sm:$0xff]  ;;  %v979_v11 = vld [vmem:[%s1279_s1 + $0x10] sm:$0xff] }
  0x10   : > { %v987_v12 = vld [vmem:[%s1279_s1 + $0x50] sm:$0xff]  ;;  %v978_v13 = vld [vmem:[%s1279_s1 + $0x8] sm:$0xff]  ;;  %v977_v15 = vld [vmem:[%s1279_s1] sm:$0xff] }
  0x11   : > { %408 = vmatpush.bf16.msra.mxu0 %v983_v3  ;;  %v986_v14 = vld [vmem:[%s1279_s1 + $0x48] sm:$0xff]  ;;  %v985_v16 = vld [vmem:[%s1279_s1 + $0x40] sm:$0xff] }
  0x12   : > { %422 = vmatpush.bf16.msra.mxu1 %v991_v4  ;;  %v833_v17 = vld [vmem:[%s1278_s0] sm:$0xf]  ;;  %v976_v18 = vld [vmem:[%s1278_s0 + $0x4] sm:$0xf0]  ;;  %v975_v19 = vld [vmem:[%s1278_s0 + $0x4] sm:$0xf] }
  0x13   : > { %v835_v20 = vld [vmem:[%s1278_s0 + $0x8] sm:$0xf0]  ;;  %v834_v21 = vor.u32 %v976_v18, %v833_v17 }
  0x14   : > { %v838_v22 = vor.u32 %v975_v19, %v835_v20 }
  0x15   : > { %409 = vmatpush.bf16.msra.mxu0 %v982_v5 }
  0x16   : > { %423 = vmatpush.bf16.msra.mxu1 %v990_v6 }
  0x19   : > { %410 = vmatpush.bf16.msra.mxu0 %v981_v7 }
  0x1a   : > { %424 = vmatpush.bf16.msra.mxu1 %v989_v8 }
  0x1d   : > { %411 = vmatpush.bf16.msra.mxu0 %v980_v9 }
  0x1e   : > { %425 = vmatpush.bf16.msra.mxu1 %v988_v10 }
  0x21   : > { %412 = vmatpush.bf16.msra.mxu0 %v979_v11 }
  0x22   : > { %426 = vmatpush.bf16.msra.mxu1 %v987_v12 }
  0x25   : > { %413 = vmatpush.bf16.msra.mxu0 %v978_v13 }
  0x26   : > { %427 = vmatpush.bf16.msra.mxu1 %v986_v14 }
  0x29   : > { %414 = vmatpush.bf16.msra.mxu0 %v977_v15 }
  0x2a   : > { %428 = vmatpush.bf16.msra.mxu1 %v985_v16 }
  0x2c   : > { %415 = vmatmul.bf16.vlgmr.msra.gmra.mxu0 %v834_v21 }
  0x2d   : > { %429 = vmatmul.bf16.vlgmr.msra.gmra.mxu1 %v838_v22 }
  0xa9   : > { %v416_v23 = vpop.f32.mrf.mxu0 }
  0xaa   : > { %v430_v24 = vpop.f32.mrf.mxu1 }
  0xab   : > { %v1187_v25 = vadd.f32 %v430_v24, %v416_v23 }
  0xaf   : > { %438 = sbr.rel (%p903_p4) target bundleno = 244 (0xf4), region = 44 }
  0xb1   : > { %v418_v26 = vpop.f32.mrf.mxu0 }
  0xb2   : > { %v432_v27 = vpop.f32.mrf.mxu1 }
  0xb3   : > { %v1189_v28 = vadd.f32 %v432_v27, %v418_v26 }
  0xb4   : > { %v457_v30 = vmul.f32 %v1187_v25, %v1187_v25  ;;  %v1071_v31 = vmov 0.0  }
  0xb5   : > { %v445_v29 = vmul.f32 0.0, %v1189_v28  ;;  %443 = vst [vmem:[#allocation2] sm:$0xff] %v1071_v31 }
  0xb7   : > { %v447_v32 = vadd.f32 %v445_v29, %v1187_v25  ;;  %v458_v33 = vmul.f32 %v445_v29, %v1189_v28 }
  0xb9   : > { %v448_v34 = vrot.slane %v447_v32, 4  ;;  %v459_v35 = vadd.f32 %v458_v33, %v457_v30 }
  0xbb   : > { %v449_v36 = vadd.f32 %v448_v34, %v447_v32  ;;  %v460_v37 = vrot.slane %v459_v35, 4 }
  0xbc   : > { %v446_v44 = vld [vmem:[#allocation2] sm:$0x1]  ;;  %v456_v49 = vld [vmem:[#allocation2 + $0x1] sm:$0x1] }
  0xbd   : > { %v450_v38 = vrot.slane %v449_v36, 2  ;;  %v461_v39 = vadd.f32 %v460_v37, %v459_v35 }
  0xbf   : > { %v451_v40 = vadd.f32 %v450_v38, %v449_v36  ;;  %v462_v41 = vrot.slane %v461_v39, 2 }
  0xc1   : > { %v452_v42 = vrot.slane %v451_v40, 1  ;;  %v463_v43 = vadd.f32 %v462_v41, %v461_v39 }
  0xc3   : > { %v453_v45 = vadd.f32 %v452_v42, %v451_v40  ;;  %v464_v46 = vrot.slane %v463_v43, 1 }
  0xc5   : > { %v454_v47 = vadd.f32 %v453_v45, %v446_v44  ;;  %v465_v48 = vadd.f32 %v464_v46, %v463_v43 }
  0xc7   : > { %455 = vst [vmem:[#allocation2] sm:$0x1] %v454_v47  ;;  %v466_v50 = vadd.f32 %v465_v48, %v456_v49 }
  0xc9   : > { %467 = vst [vmem:[#allocation2 + $0x1] sm:$0x1] %v466_v50 }
  0xce   : > { %v471_v51 = vld [vmem:[#allocation2] sm:$0x1] }
  0xcf   : > { %v472_v52 = vmul.f32 0.125, %v471_v51 }
  0xd0   : > { %v473_v53 = vld [vmem:[#allocation2 + $0x1] sm:$0x1] }
  0xd1   : > { %v474_v54 = vmul.f32 0.125, %v473_v53  ;;  %v475_v55 = vmul.f32 %v472_v52, %v472_v52 }
  0xd3   : > { %v476_v56 = vsub.f32 %v474_v54, %v475_v55 }
  0xd5   : > { %v477_v57 = vmax.f32 %v476_v56, 0.0 }
  0xd7   : > { %v478_v58 = vadd.f32 1e-05, %v477_v57 }
  0xd9   : > { %1039 = vrsqrt.f32 %v478_v58  ;;  %vm485_vm1 = vweird.f32 %v478_v58 }
  0xdf   : > { %v1040_v59 = vpop.eup %1039 }
  0xe0   : > { %v480_v60 = vmul.f32 %v1040_v59, %v478_v58  ;;  %vm486_vm0 = vweird.f32 %v1040_v59 }
  0xe1   : > { %vm487_vm2 = vmor %vm485_vm1, %vm486_vm0 }
  0xe2   : > { %v481_v61 = vmul.f32 %v1040_v59, %v480_v60 }
  0xe4   : > { %v482_v62 = vmul.f32 0.5, %v481_v61 }
  0xe6   : > { %v483_v63 = vsub.f32 1.5, %v482_v62 }
  0xe8   : > { %v484_v1 = vmul.f32 %v1040_v59, %v483_v63 }
  0xea   : > { %v488_v2 = vsel %vm487_vm2, %v1040_v59, %v484_v1 }
  0xeb   : > { %v489_v3 = vmul.f32 %v488_v2, %v1125_v0 }
  0xed   : > { %490 = vst [vmem:[#allocation2 + $0x4] sm:$0x1] %v489_v3  ;;  %v491_v4 = vmul.f32 %v489_v3, %v472_v52 }
  0xef   : > { %v493_v5 = vrot.slane %v491_v4, 7 }
  0xf1   : > { %v495_v6 = vsub.f32 %v1125_v0, %v493_v5 }
  0xf3   : > { %496 = vst [vmem:[#allocation2 + $0x4] sm:$0x2] %v495_v6 }
  0xf4 PF: > { %p904_p5 = scmp.le.s32.totalorder %s1061_s18, 0 }
  0xf5   : > { %p937_p6 = scmp.ne.s32.totalorder (!%p904_p5), %s1061_s18, 1 }
  0xf6   : > { %500 = sbr.rel (%p904_p5) target bundleno = 662 (0x296), region = 56 }
  0xfb   : > { %v1000_v7 = vld [vmem:[%s1280_s2 + $0x38] sm:$0xff]  ;;  %v999_v8 = vld [vmem:[%s1280_s2 + $0x30] sm:$0xff]  ;;  %v998_v9 = vld [vmem:[%s1280_s2 + $0x28] sm:$0xff] }
  0xfc   : > { %576 = vmatpush.bf16.msra.mxu0 %v1000_v7  ;;  %v997_v10 = vld [vmem:[%s1280_s2 + $0x20] sm:$0xff]  ;;  %v996_v12 = vld [vmem:[%s1280_s2 + $0x18] sm:$0xff]  ;;  %v995_v16 = vld [vmem:[%s1280_s2 + $0x10] sm:$0xff] }
  0xfd   : > { %v1041_v11 = vld [vmem:[#allocation2 + $0x4] ss:$0 sm:$0xff]  ;;  %v1042_v15 = vld [vmem:[#allocation2 + $0x5] ss:$0 sm:$0xff]  ;;  %v994_v19 = vld [vmem:[%s1280_s2 + $0x8] sm:$0xff] }
  0xfe   : > { %v503_v13 = vmul.f32 %v1041_v11, %v1187_v25  ;;  %v504_v14 = vmul.f32 %v1041_v11, %v1189_v28  ;;  %v993_v22 = vld [vmem:[%s1280_s2] sm:$0xff] }
 0x100   : > { %577 = vmatpush.bf16.msra.mxu0 %v999_v8  ;;  %v507_v17 = vadd.f32 %v1042_v15, %v503_v13  ;;  %v508_v18 = vadd.f32 %v1042_v15, %v504_v14 }
 0x102   : > { %v509_v20 = vmax.f32 %v507_v17, 0.0  ;;  %v510_v21 = vmax.f32 %v508_v18, 0.0 }
 0x104   : > { %578 = vmatpush.bf16.msra.mxu0 %v998_v9  ;;  %v511_v23 = vpack.c.bf16 %v510_v21, %v509_v20 }
 0x108   : > { %579 = vmatpush.bf16.msra.mxu0 %v997_v10 }
 0x10c   : > { %580 = vmatpush.bf16.msra.mxu0 %v996_v12 }
 0x110   : > { %581 = vmatpush.bf16.msra.mxu0 %v995_v16 }
 0x114   : > { %582 = vmatpush.bf16.msra.mxu0 %v994_v19 }
 0x118   : > { %583 = vmatpush.bf16.msra.mxu0 %v993_v22 }
 0x11b   : > { %584 = vmatmul.bf16.vlgmr.msra.gmra.mxu0 %v511_v23 }
 0x198   : > { %v1226_v24 = vpop.f32.mrf.mxu0 }
 0x19c   : > { %593 = sbr.rel (%p937_p6) target bundleno = 484 (0x1e4), region = 60 }
 0x1a0   : > { %v1228_v25 = vpop.f32.mrf.mxu0 }
 0x1a1   : > { %v595_v26 = vmul.f32 0.0, %v1228_v25  ;;  %v607_v27 = vmul.f32 %v1226_v24, %v1226_v24  ;;  %v596_v40 = vld [vmem:[#allocation2 + $0x2] sm:$0x1]  ;;  %v606_v43 = vld [vmem:[#allocation2 + $0x3] sm:$0x1] }
 0x1a3   : > { %v597_v28 = vadd.f32 %v595_v26, %v1226_v24  ;;  %v608_v29 = vmul.f32 %v595_v26, %v1228_v25 }
 0x1a5   : > { %v598_v30 = vrot.slane %v597_v28, 4  ;;  %v609_v31 = vadd.f32 %v608_v29, %v607_v27 }
 0x1a7   : > { %v599_v32 = vadd.f32 %v598_v30, %v597_v28  ;;  %v610_v33 = vrot.slane %v609_v31, 4 }
 0x1a9   : > { %v600_v34 = vrot.slane %v599_v32, 2  ;;  %v611_v35 = vadd.f32 %v610_v33, %v609_v31 }
 0x1ab   : > { %v601_v36 = vadd.f32 %v600_v34, %v599_v32  ;;  %v612_v37 = vrot.slane %v611_v35, 2 }
 0x1ad   : > { %v602_v38 = vrot.slane %v601_v36, 1  ;;  %v613_v39 = vadd.f32 %v612_v37, %v611_v35 }
 0x1af   : > { %v603_v41 = vadd.f32 %v602_v38, %v601_v36  ;;  %v614_v42 = vrot.slane %v613_v39, 1 }
 0x1b1   : > { %v604_v44 = vadd.f32 %v603_v41, %v596_v40  ;;  %v615_v45 = vadd.f32 %v614_v42, %v613_v39 }
 0x1b3   : > { %605 = vst [vmem:[#allocation2 + $0x2] sm:$0x1] %v604_v44  ;;  %v616_v46 = vadd.f32 %v615_v45, %v606_v43 }
 0x1b5   : > { %617 = vst [vmem:[#allocation2 + $0x3] sm:$0x1] %v616_v46 }
 0x1ba   : > { %v622_v47 = vld [vmem:[#allocation2 + $0x2] sm:$0x1] }
 0x1bb   : > { %v623_v48 = vmul.f32 0.125, %v622_v47 }
 0x1bc   : > { %v624_v49 = vld [vmem:[#allocation2 + $0x3] sm:$0x1] }
 0x1bd   : > { %v625_v50 = vmul.f32 0.125, %v624_v49  ;;  %v626_v51 = vmul.f32 %v623_v48, %v623_v48 }
 0x1bf   : > { %v627_v52 = vsub.f32 %v625_v50, %v626_v51 }
 0x1c1   : > { %v628_v53 = vmax.f32 %v627_v52, 0.0 }
 0x1c3   : > { %v629_v54 = vadd.f32 1e-05, %v628_v53 }
 0x1c5   : > { %1043 = vrsqrt.f32 %v629_v54  ;;  %vm636_vm4 = vweird.f32 %v629_v54 }
 0x1cb   : > { %v1044_v55 = vpop.eup %1043 }
 0x1cc   : > { %v631_v56 = vmul.f32 %v1044_v55, %v629_v54  ;;  %vm637_vm3 = vweird.f32 %v1044_v55 }
 0x1cd   : > { %vm638_vm5 = vmor %vm636_vm4, %vm637_vm3 }
 0x1ce   : > { %v632_v57 = vmul.f32 %v1044_v55, %v631_v56 }
 0x1d0   : > { %v633_v58 = vmul.f32 0.5, %v632_v57 }
 0x1d2   : > { %v634_v59 = vsub.f32 1.5, %v633_v58 }
 0x1d4   : > { %v635_v60 = vmul.f32 %v1044_v55, %v634_v59 }
 0x1d6   : > { %v639_v61 = vsel %vm638_vm5, %v1044_v55, %v635_v60 }
 0x1d7   : > { %v641_v62 = vrot.slane %v639_v61, 6 }
 0x1d9   : > { %v643_v63 = vmul.f32 %v641_v62, %v1125_v0 }
 0x1db   : > { %644 = vst [vmem:[#allocation2 + $0x4] sm:$0x4] %v643_v63  ;;  %v646_v1 = vrot.slane %v643_v63, 2 }
 0x1dd   : > { %v648_v2 = vmul.f32 %v646_v1, %v623_v48 }
 0x1df   : > { %v650_v3 = vrot.slane %v648_v2, 5 }
 0x1e1   : > { %v652_v4 = vsub.f32 %v1125_v0, %v650_v3 }
 0x1e3   : > { %653 = vst [vmem:[#allocation2 + $0x4] sm:$0x8] %v652_v4 }
 0x1e4 PF: > { %p938_p7 = scmp.ne.s32.totalorder %s1061_s18, 2 }
 0x1e6   : > { %657 = sbr.rel (%p938_p7) target bundleno = 662 (0x296), region = 68 }
 0x1eb   : > { %v1008_v5 = vld [vmem:[%s1281_s3 + $0x38] sm:$0xff]  ;;  %v1007_v6 = vld [vmem:[%s1281_s3 + $0x30] sm:$0xff]  ;;  %v1006_v7 = vld [vmem:[%s1281_s3 + $0x28] sm:$0xff]  ;;  %v685_v23 = vperm.slane %v1125_v0, 4 }
 0x1ec   : > { %734 = vmatpush.bf16.msra.mxu0 %v1008_v5  ;;  %v1005_v8 = vld [vmem:[%s1281_s3 + $0x20] sm:$0xff]  ;;  %v1004_v10 = vld [vmem:[%s1281_s3 + $0x18] sm:$0xff]  ;;  %v1003_v14 = vld [vmem:[%s1281_s3 + $0x10] sm:$0xff] }
 0x1ed   : > { %v1045_v9 = vld [vmem:[#allocation2 + $0x6] ss:$0 sm:$0xff]  ;;  %v1046_v13 = vld [vmem:[#allocation2 + $0x7] ss:$0 sm:$0xff]  ;;  %v1002_v17 = vld [vmem:[%s1281_s3 + $0x8] sm:$0xff] }
 0x1ee   : > { %v660_v11 = vmul.f32 %v1045_v9, %v1226_v24  ;;  %v661_v12 = vmul.f32 %v1045_v9, %v1228_v25  ;;  %v1001_v20 = vld [vmem:[%s1281_s3] sm:$0xff] }
 0x1f0   : > { %735 = vmatpush.bf16.msra.mxu0 %v1007_v6  ;;  %v664_v15 = vadd.f32 %v1046_v13, %v660_v11  ;;  %v665_v16 = vadd.f32 %v1046_v13, %v661_v12 }
 0x1f2   : > { %v666_v18 = vmax.f32 %v664_v15, 0.0  ;;  %v667_v19 = vmax.f32 %v665_v16, 0.0 }
 0x1f4   : > { %736 = vmatpush.bf16.msra.mxu0 %v1006_v7  ;;  %v668_v21 = vpack.c.bf16 %v667_v19, %v666_v18 }
 0x1f8   : > { %737 = vmatpush.bf16.msra.mxu0 %v1005_v8 }
 0x1fc   : > { %738 = vmatpush.bf16.msra.mxu0 %v1004_v10 }
 0x200   : > { %739 = vmatpush.bf16.msra.mxu0 %v1003_v14 }
 0x204   : > { %740 = vmatpush.bf16.msra.mxu0 %v1002_v17 }
 0x208   : > { %741 = vmatpush.bf16.msra.mxu0 %v1001_v20 }
 0x20b   : > { %742 = vmatmul.bf16.vlgmr.msra.gmra.mxu0 %v668_v21 }
 0x288   : > { %v743_v22 = vpop.f32.mrf.mxu0 }
 0x289   : > { %v744_v25 = vadd.f32 %v743_v22, %v685_v23 }
 0x290   : > { %v745_v24 = vpop.f32.mrf.mxu0 }
 0x291   : > { %v746_v26 = vadd.f32 %v745_v24, %v685_v23 }
 0x293   : > { %v1012_v27 = vpack.c.bf16 %v746_v26, %v744_v25 }
 0x295   : > { %1013 = vst [vmem:[%s1283_s5] sm:$0xff] %v1012_v27  }
 0x296 PF: > { %s15_s20 = sadd.s32 1, %s1069_s20   ;;  %s1284_s18 = smov %s1065_s19 }
 0x297   : > { %p12_p8 = scmp.ge.s32.totalorder %s15_s20, 5   ;;  %s1285_s19 = smov %s1287_s21 }
 0x299   :  { %14 = sbr.rel (!%p12_p8) target bundleno = 2 (0x2), region = 98 }

</bundles_post_ra>
